<compile_context>
chip_gen: v5e
topology: v5e:2x2
jax: 0.10.0
libtpu: 0.0.40
codegen_flags: <defaults>
</compile_context>

<pallas_src>
import math
import functools

import jax
import jax.numpy as jnp
from jax import lax
from jax.experimental import pallas as pl
from jax.experimental.pallas import tpu as pltpu

_LOG2 = math.log(2.0)
_VMEM_LIMIT_BYTES = 48 * 1024 * 1024   # safe on v5e/v6e (128 MiB) and v7x (64 MiB)


def _round_up(n, m):
    return ((n + m - 1) // m) * m


def _cdiv(a, b):
    return -(-a // b)


def _simple_mlp_kernel(x_ref, w1t_ref, w2_ref, o_ref, *, act_dtype):
    # x_ref  : (TB, dim)  VMEM, one batch tile; fetched once per batch tile
    # w1t_ref: (dim, TH)  VMEM, one hidden-column block of fc1.weight^T
    # w2_ref : (1, TH)    VMEM, matching hidden block of fc2.weight
    # o_ref  : (1, TB)    VMEM, lane-dense output row, resident across hidden axis
    j = pl.program_id(1)

    @pl.when(j == 0)
    def _():
        o_ref[...] = jnp.zeros_like(o_ref)

    # fc1: (TB, dim) @ (dim, TH) -> (TB, TH) on the MXU, f32 accumulate.
    h = jnp.dot(x_ref[...], w1t_ref[...], preferred_element_type=jnp.float32)

    # lncosh without the -log2 constant (folded out; added once in the wrapper):
    #   log(cosh(h)) + log2 = |h| + log1p(exp(-2|h|))
    ah = jnp.abs(h).astype(act_dtype)
    a = ah + jnp.log1p(jnp.exp(-2.0 * ah))

    # fc2 partial + sum(dim=1): contract TH of (1, TH) against TH of (TB, TH)
    # -> (1, TB) lane-dense row, accumulated over the hidden grid axis.
    # TODO(synk): confirm via bundle dump that this does not lower to a full
    # (TB, TH) vxpose; if it does, use jnp.dot(a, w2.T) -> (TB, 1) plus a small
    # column transpose instead.
    o_ref[...] += lax.dot_general(
        w2_ref[...].astype(a.dtype), a,
        dimension_numbers=(((1,), (1,)), ((), ())),
        preferred_element_type=jnp.float32,
    )


def _choose_tiles(B, dim, hidden, in_bytes, block_b=None, block_h=None):
    """Pick (batch tile, hidden tile) sizes within a fixed VMEM budget."""
    # Batch tile: move >= ~1 MiB of x per grid step (amortizes the ~0.35 us
    # per-step overhead), 128-aligned, balanced over B to minimize padding.
    if block_b is None:
        tb_target = min(1 << 14, max(512, (1 << 20) // max(1, dim * in_bytes)))
    else:
        tb_target = block_b
    tb_target = max(128, _round_up(tb_target, 128))
    if B <= tb_target:
        tb = _round_up(B, 8)
    else:
        tb = _round_up(_cdiv(B, _cdiv(B, tb_target)), 128)
    nb = _cdiv(B, tb)
    b_pad = nb * tb

    # Hidden tile: bound the (TB, TH) f32 intermediates (h and a: 8 B/elem) plus
    # a double-buffered (dim, TH) weight block to ~28 MiB so the whole kernel
    # fits comfortably under the 48 MiB VMEM limit (v7x has 64 MiB physical).
    if block_h is None:
        th_cap = (28 << 20) // (tb * 8 + 2 * dim * in_bytes)
    else:
        th_cap = block_h
    if hidden <= max(th_cap, 128):
        th, h_pad = hidden, hidden
    else:
        th = max(128, (th_cap // 128) * 128)
        h_pad = _round_up(hidden, th)
    nh = h_pad // th
    return tb, nb, b_pad, th, nh, h_pad


@functools.partial(
    jax.jit,
    static_argnames=("compute_dtype", "activation_dtype", "block_b", "block_h"),
)
def simple_mlp_forward(x, w1, w2, *, compute_dtype=jnp.float32,
                       activation_dtype=jnp.float32, block_b=None, block_h=None):
    """forward(x) = sum_dim1( lncosh(x @ w1.T) @ w2.T ) -> shape (B,).

    compute_dtype / activation_dtype = jnp.bfloat16 is recommended on v6e/v7x
    (halves x/w1t HBM bytes, feeds the bf16 MXU/EUP) at reduced accuracy.
    """
    B, dim = x.shape
    hidden, dim_w = w1.shape
    assert dim_w == dim
    assert w2.shape == (1, hidden)

    in_bytes = jnp.dtype(compute_dtype).itemsize
    tb, nb, b_pad, th, nh, h_pad = _choose_tiles(
        B, dim, hidden, in_bytes, block_b=block_b, block_h=block_h)

    # One-time weight transpose / cast in the wrapper (not per grid step).
    w1t = jnp.transpose(w1).astype(compute_dtype)      # (dim, hidden)
    w2f = w2.astype(jnp.float32)                       # (1, hidden)
    if h_pad != hidden:
        # Zero-padded hidden columns: w2 padding of 0 kills their contribution.
        w1t = jnp.pad(w1t, ((0, 0), (0, h_pad - hidden)))
        w2f = jnp.pad(w2f, ((0, 0), (0, h_pad - hidden)))

    xp = x.astype(compute_dtype)
    if b_pad != B:
        xp = jnp.pad(xp, ((0, b_pad - B), (0, 0)))     # extra rows are sliced off

    kernel = functools.partial(_simple_mlp_kernel, act_dtype=activation_dtype)

    out = pl.pallas_call(
        kernel,
        out_shape=jax.ShapeDtypeStruct((1, b_pad), jnp.float32),
        grid=(nb, nh),
        in_specs=[
            pl.BlockSpec((tb, dim), lambda i, j: (i, 0)),   # x batch tile
            pl.BlockSpec((dim, th), lambda i, j: (0, j)),   # w1^T column block
            pl.BlockSpec((1, th), lambda i, j: (0, j)),     # w2 column block
        ],
        out_specs=pl.BlockSpec((1, tb), lambda i, j: (0, i)),  # lane-dense row
        compiler_params=pltpu.CompilerParams(
            # batch axis shards across TensorCores; hidden axis is a reduction.
            dimension_semantics=("parallel", "arbitrary"),
            vmem_limit_bytes=_VMEM_LIMIT_BYTES,
        ),
    )(xp, w1t, w2f)

    # Fold the "- log 2" constant back in:  sum_h w2[0,h] * (-log2)  per row.
    corr = (-_LOG2) * jnp.sum(w2.astype(jnp.float32))
    return out[0, :B] + corr


def _reference_forward(x, w1, w2):
    # Pure-JAX reference of the PyTorch forward (use_z2=True)
    h = x @ w1.T
    a = -h + jnp.logaddexp(0.0, 2.0 * h) - _LOG2     # lncosh
    out = a @ w2.T
    return out.sum(axis=1)


def _torch_linear_init(key, out_features, in_features):
    # Mimics nn.Linear default init: U(-1/sqrt(fan_in), 1/sqrt(fan_in))
    bound = 1.0 / math.sqrt(in_features)
    return jax.random.uniform(
        key, (out_features, in_features), jnp.float32, minval=-bound, maxval=bound
    )


if __name__ == "__main__":
    key = jax.random.PRNGKey(0)
    kx, k1, k2, kx2, k3, k4, kx3 = jax.random.split(key, 7)

    # Small shapes consistent with Simple_MLP(dim=16, hidden_size=32), batch 8.
    B, dim, hidden = 8, 16, 32
    x = jax.random.normal(kx, (B, dim), jnp.float32)
    w1 = _torch_linear_init(k1, hidden, dim)   # fc1.weight (no bias, use_z2=True)
    w2 = _torch_linear_init(k2, 1, hidden)     # fc2.weight (no bias)

    y = jax.block_until_ready(simple_mlp_forward(x, w1, w2))
    y_ref = _reference_forward(x, w1, w2)
    assert y.shape == (B,)
    assert jnp.allclose(y, y_ref, atol=1e-5, rtol=1e-5)

    # Non-multiple-of-128 batch: exercises the minimal-padding single-tile path.
    B2 = 1100
    x2 = jax.random.normal(kx2, (B2, dim), jnp.float32)
    y2 = jax.block_until_ready(simple_mlp_forward(x2, w1, w2))
    y2_ref = _reference_forward(x2, w1, w2)
    assert y2.shape == (B2,)
    assert jnp.allclose(y2, y2_ref, atol=1e-5, rtol=1e-5)

    # bf16-input fast path (recommended on v6e/v7x): relaxed tolerance.
    y2b = jax.block_until_ready(
        simple_mlp_forward(x2, w1, w2, compute_dtype=jnp.bfloat16))
    assert jnp.allclose(y2b, y2_ref, atol=5e-2, rtol=5e-2)

    # Force multi-tile batch AND hidden-reduction tiling at small sizes
    # (block_b/block_h overrides) to exercise the accumulator grid path.
    B3, hidden3 = 300, 384
    x3 = jax.random.normal(kx3, (B3, dim), jnp.float32)
    w1b = _torch_linear_init(k3, hidden3, dim)
    w2b = _torch_linear_init(k4, 1, hidden3)
    y3 = jax.block_until_ready(
        simple_mlp_forward(x3, w1b, w2b, block_b=128, block_h=128))
    y3_ref = _reference_forward(x3, w1b, w2b)
    assert y3.shape == (B3,)
    assert jnp.allclose(y3, y3_ref, atol=1e-4, rtol=1e-4)

    print("KERNEL_OK")
</pallas_src>

<mosaic_0001>
module attributes {stable_mosaic.version = 11 : i64} {
  func.func @_simple_mlp_kernel(%arg0: i32, %arg1: i32, %arg2: memref<8x16xf32, #tpu.memory_space<vmem>>, %arg3: memref<16x32xf32, #tpu.memory_space<vmem>>, %arg4: memref<1x32xf32, #tpu.memory_space<vmem>>, %arg5: memref<1x8xf32, #tpu.memory_space<vmem>>) attributes {dimension_semantics = [#tpu.dimension_semantics<parallel>, #tpu.dimension_semantics<arbitrary>], iteration_bounds = array<i64: 1, 1>, scalar_prefetch = 0 : i64, scratch_operands = 0 : i64, tpu.core_type = #tpu.core_type<tc>, window_params = [{transform_indices = @transform_0, window_bounds = array<i64: 8, 16>}, {transform_indices = @transform_1, window_bounds = array<i64: 16, 32>}, {transform_indices = @transform_2, window_bounds = array<i64: 1, 32>}, {transform_indices = @transform_3, window_bounds = array<i64: 1, 8>}]} {
    %c0_i32 = arith.constant 0 : i32
    %0 = arith.cmpi eq, %arg1, %c0_i32 : i32
    %1 = arith.extui %0 : i1 to i32
    %c0_i32_0 = arith.constant 0 : i32
    %2 = arith.cmpi ne, %1, %c0_i32_0 : i32
    scf.if %2 {
      %cst_12 = arith.constant 0.000000e+00 : f32
      %17 = vector.broadcast %cst_12 : f32 to vector<1x8xf32>
      %c0_13 = arith.constant 0 : index
      %c0_14 = arith.constant 0 : index
      %18 = vector.load %arg5[%c0_13, %c0_14] : memref<1x8xf32, #tpu.memory_space<vmem>>, vector<1x8xf32>
      tpu.vector_store %arg5[%c0_13, %c0_14], %17 {strides = array<i32>} : memref<1x8xf32, #tpu.memory_space<vmem>>, vector<1x8xf32>,
    } else {
    }
    %c0 = arith.constant 0 : index
    %c0_1 = arith.constant 0 : index
    %3 = vector.load %arg2[%c0, %c0_1] : memref<8x16xf32, #tpu.memory_space<vmem>>, vector<8x16xf32>
    %c0_2 = arith.constant 0 : index
    %c0_3 = arith.constant 0 : index
    %4 = vector.load %arg3[%c0_2, %c0_3] : memref<16x32xf32, #tpu.memory_space<vmem>>, vector<16x32xf32>
    %cst = arith.constant dense<0.000000e+00> : vector<8x32xf32>
    %5 = tpu.matmul %3, %4, %cst {dimension_numbers = #tpu.dot_dimension_numbers<[1], [0], [0], [1], [0, 0, 1, 1], [], []>} : vector<8x16xf32>, vector<16x32xf32>, vector<8x32xf32> -> vector<8x32xf32>
    %6 = math.absf %5 : vector<8x32xf32>
    %cst_4 = arith.constant -2.000000e+00 : f32
    %7 = vector.broadcast %cst_4 : f32 to vector<8x32xf32>
    %8 = arith.mulf %7, %6 : vector<8x32xf32>
    %9 = math.exp %8 : vector<8x32xf32>
    %10 = math.log1p %9 : vector<8x32xf32>
    %11 = arith.addf %6, %10 : vector<8x32xf32>
    %c0_5 = arith.constant 0 : index
    %c0_6 = arith.constant 0 : index
    %12 = vector.load %arg5[%c0_5, %c0_6] : memref<1x8xf32, #tpu.memory_space<vmem>>, vector<1x8xf32>
    %c0_7 = arith.constant 0 : index
    %c0_8 = arith.constant 0 : index
    %13 = vector.load %arg4[%c0_7, %c0_8] : memref<1x32xf32, #tpu.memory_space<vmem>>, vector<1x32xf32>
    %cst_9 = arith.constant dense<0.000000e+00> : vector<1x8xf32>
    %14 = tpu.matmul %13, %11, %cst_9 {dimension_numbers = #tpu.dot_dimension_numbers<[1], [1], [0], [0], [0, 0, 1, 0], [], []>} : vector<1x32xf32>, vector<8x32xf32>, vector<1x8xf32> -> vector<1x8xf32>
    %15 = arith.addf %12, %14 : vector<1x8xf32>
    %c0_10 = arith.constant 0 : index
    %c0_11 = arith.constant 0 : index
    %16 = vector.load %arg5[%c0_10, %c0_11] : memref<1x8xf32, #tpu.memory_space<vmem>>, vector<1x8xf32>
    tpu.vector_store %arg5[%c0_10, %c0_11], %15 {strides = array<i32>} : memref<1x8xf32, #tpu.memory_space<vmem>>, vector<1x8xf32>,
    return
  }
  func.func @transform_0(%arg0: i32, %arg1: i32) -> (i32, i32) {
    %c0_i32 = arith.constant 0 : i32
    %c0_i32_0 = arith.constant 0 : i32
    return %arg0, %c0_i32 : i32, i32
  }
  func.func @transform_1(%arg0: i32, %arg1: i32) -> (i32, i32) {
    %c0_i32 = arith.constant 0 : i32
    %c0_i32_0 = arith.constant 0 : i32
    return %c0_i32, %arg1 : i32, i32
  }
  func.func @transform_2(%arg0: i32, %arg1: i32) -> (i32, i32) {
    %c0_i32 = arith.constant 0 : i32
    %c0_i32_0 = arith.constant 0 : i32
    return %c0_i32, %arg1 : i32, i32
  }
  func.func @transform_3(%arg0: i32, %arg1: i32) -> (i32, i32) {
    %c0_i32 = arith.constant 0 : i32
    %c0_i32_0 = arith.constant 0 : i32
    return %c0_i32, %arg0 : i32, i32
  }
}

</mosaic_0001>

<bundles_post_ra>
// kernel: simple_mlp_forward.1
= control target key start
LH: loop header
LB: loop body
LE: loop exit
PB: predicated region body
PF: predicated region fallthrough
CT: control target
= control target key end

     0   :  { %8 = vsyncpa [#allocation3], 0  ;;  %s238_s0 = inlined_call_operand.hbm [shape: f32[8,16], index: 0, kind: input, shape index: {}]   ;;  %s239_s1 = inlined_call_operand.hbm [shape: f32[16,32], index: 1, kind: input, shape index: {}]   ;;  %s240_s2 = inlined_call_operand.vmem [shape: f32[1,32], index: 2, kind: input, shape index: {}]   ;;  %s241_s3 = inlined_call_operand.vmem [shape: f32[1,8], index: 3, kind: output, shape index: {}]  }
   0x1   :  { %s15_s14 = sshll.u32 %s238_s0, 4  ;;  %s16_s14 = int_to_ptr.hbm [resolvable:$true] %s15_s14 }
   0x2   :  { %9 = vsyncpa [#allocation5], 0  ;;  %s193_s15 = smov [#allocation2]   ;;  %s25_s19 = sshll.u32 %s239_s1, 4  ;;  %s26_s19 = int_to_ptr.hbm [resolvable:$true] %s25_s19 }
   0x3   :  { %s17_s16 = sshll.u32 %s193_s15, 4  ;;  %s194_s20 = smov [#allocation4]   ;;  %s18_s16 = int_to_ptr.vmem [resolvable:$true] %s17_s16 }
   0x4   :  { %20 = dma.hbm_to_vmem [thread:$0]  %s16_s14, 128, %s18_s16, [#allocation3]  }
   0x5   :  { %s27_s21 = sshll.u32 %s194_s20, 4  ;;  %s195_s22 = smov 128   ;;  %s28_s21 = int_to_ptr.vmem [resolvable:$true] %s27_s21 }
   0x6   :  { %s196_s23 = smov 8  }
   0x7   :  { %33 = dma.hbm_to_vmem [thread:$0]  %s26_s19, 256, %s28_s21, [#allocation5], %s195_s22, %s195_s22, %s196_s23  }
   0x8   :  { %189 = dma.done.wait [#allocation3], 128  }
   0x9   :  { %190 = vsyncadd [#allocation3], 4294967168 }
   0xa   :  { %191 = dma.done.wait [#allocation5], 256  }
   0xb   :  { %192 = vsyncadd [#allocation5], 4294967040  ;;  %vm48_vm0 = vcmask 57344   ;;  %v197_v0 = vmov 0.0   ;;  %v52_v1 = vld [vmem:[#allocation4 + $0x8] sm:$0xff]  ;;  %v51_v2 = vld [vmem:[#allocation4] sm:$0xff] }
   0xc   :  { %49 = vst.msk [vmem:[%s241_s3] sm:$0x1] %vm48_vm0, %v197_v0  ;;  %71 = vmatpush.msra.mxu0 %v52_v1  ;;  %v50_v3 = vld [vmem:[#allocation2] sm:$0xff]  ;;  %vm53_vm1 = vcmask 130048   ;;  %vm93_vm3 = vcmask 261120  }
   0xd   :  { %v92_v18 = vld [vmem:[%s240_s2] sm:$0x1] }
   0xe   :  { %72 = vmatpush.msra.mxu0 %v51_v2 }
   0xf   :  { %129 = vmatmul.msk.f32.vlgmr.msra.gmra.mxu0 %vm53_vm1, %v50_v3 }
  0x13   :  { %v91_v19 = vld [vmem:[%s241_s3] sm:$0x1] }
  0x8c   :  { %v74_v4 = vpop.f32.mrf.mxu0 }
  0x8d   :  { %v77_v5 = vand.u32 2147483647, %v74_v4 }
  0x8f   :  { %v78_v6 = vmul.f32 -2.0, %v77_v5 }
  0x91   :  { %v79_v7 = vmul.f32 1.442695, %v78_v6 }
  0x93   :  { %137 = vpow2.f32 %v79_v7 }
  0x99   :  { %v138_v8 = vpop.eup %137 }
  0x9a   :  { %v81_v9 = vadd.f32 1.0, %v138_v8  ;;  %v84_v10 = vmul.f32 -0.5, %v138_v8  ;;  %v87_v12 = vand.u32 2147483647, %v138_v8 }
  0x9c   :  { %139 = vlog2.f32 %v81_v9  ;;  %v85_v11 = vadd.f32 1.0, %v84_v10  ;;  %vm88_vm2 = vcmp.lt.f32.partialorder %v87_v12, 0.0004427343 }
  0x9e   :  { %v86_v15 = vmul.f32 %v138_v8, %v85_v11 }
  0xa2   :  { %v140_v13 = vpop.eup %139 }
  0xa3   :  { %v83_v14 = vmul.f32 0.6931472, %v140_v13 }
  0xa5   :  { %v89_v16 = vsel %vm88_vm2, %v86_v15, %v83_v14 }
  0xa6   :  { %v90_v17 = vadd.f32 %v89_v16, %v77_v5 }
  0xa8   :  { %130 = vmatpush.xpose.msk.msra.mxu1 %vm93_vm3, %v90_v17 }
  0xab   :  { %131 = vmatmul.msk.f32.vlgmr.msra.gmra.mxu1 %vm93_vm3, %v92_v18 }
 0x128   :  { %v117_v20 = vpop.f32.mrf.mxu1 }
 0x129   :  { %v120_v21 = vadd.f32 %v117_v20, %v91_v19 }
 0x12b   :  { %122 = vst.msk [vmem:[%s241_s3] sm:$0x1] %vm48_vm0, %v120_v21 }
 0x12c   :  { %127 = vsyncpa [#allocation3], 1 }
 0x12d   :  { %128 = vsyncpa [#allocation5], 1 }

</bundles_post_ra>
